<compile_context>
chip_gen: v6e
topology: v6e:2x2x1
jax: 0.10.0
libtpu: 0.0.40
codegen_flags: <defaults>
</compile_context>

<pallas_src>
import jax
import jax.numpy as jnp
from jax.experimental import pallas as pl
from jax.experimental.pallas import tpu as pltpu


def _power_exp_kernel(xm_ref, xv_ref, mean_ref, var_ref):
    # Blocks are (1, 1, block_rows, cols) lane-dense slabs.
    mean_ref[...] = xm_ref[...]
    var_ref[...] = jnp.exp(xv_ref[...])


_LANES = 128
_TARGET_BLOCK_BYTES = 1 << 20  # ~1 MiB per block ~= 85% of HBM roofline


def power_exponential_output(x):
    """Pallas TPU implementation of PowerExponentialOutput.forward.

    Args:
      x: (N, 2, H, W) array (NCHW, C == 2).
    Returns:
      (mean, variance): each (N, 1, H, W); variance = exp(x[:, 1:2]).
    """
    assert x.ndim == 4 and x.shape[1] == 2, "expected NCHW input with C == 2"
    N, C, H, W = x.shape
    L = H * W
    itemsize = jnp.dtype(x.dtype).itemsize

    # Free (contiguous) reshape to a lane-dense layout.
    if L % _LANES == 0:
        rows, cols = L // _LANES, _LANES
    else:
        # Fallback: put the whole spatial slab on the lane axis (full-dim block).
        rows, cols = 1, L
    x4 = x.reshape(N, C, rows, cols)

    # Largest row tile within the byte budget, multiple of 8 sublanes (or the
    # full dim if rows already fits).
    max_block_rows = max(8, (_TARGET_BLOCK_BYTES // (cols * itemsize)) // 8 * 8)
    block_rows = rows if rows <= max_block_rows else max_block_rows
    num_row_tiles = pl.cdiv(rows, block_rows)

    blk = (1, 1, block_rows, cols)
    out_shape = (
        jax.ShapeDtypeStruct((N, 1, rows, cols), x.dtype),
        jax.ShapeDtypeStruct((N, 1, rows, cols), x.dtype),
    )

    # 2 inputs + 2 outputs, each double-buffered.
    est_vmem = 4 * 2 * block_rows * cols * itemsize
    cp_kwargs = dict(dimension_semantics=("parallel", "parallel"))
    if est_vmem > 12 * 1024 * 1024:
        cp_kwargs["vmem_limit_bytes"] = min(int(est_vmem * 3 // 2), 100 * 1024 * 1024)

    mean, variance = pl.pallas_call(
        _power_exp_kernel,
        grid=(N, num_row_tiles),
        in_specs=[
            # Channel 0 (mean) and channel 1 (variance) as separate tiles of
            # the same input array: no in-kernel slicing.
            pl.BlockSpec(blk, lambda n, t: (n, 0, t, 0)),
            pl.BlockSpec(blk, lambda n, t: (n, 1, t, 0)),
        ],
        out_specs=[
            pl.BlockSpec(blk, lambda n, t: (n, 0, t, 0)),
            pl.BlockSpec(blk, lambda n, t: (n, 0, t, 0)),
        ],
        out_shape=out_shape,
        compiler_params=pltpu.CompilerParams(**cp_kwargs),
    )(x4, x4)

    return mean.reshape(N, 1, H, W), variance.reshape(N, 1, H, W)


if __name__ == "__main__":
    key = jax.random.PRNGKey(0)
    N, C, H, W = 2, 2, 16, 16
    x = jax.random.normal(key, (N, C, H, W), dtype=jnp.float32)

    mean, variance = power_exponential_output(x)
    jax.block_until_ready((mean, variance))

    # Reference check against plain JAX (mirrors the PyTorch semantics).
    ref_mean = x[:, 0:1, :, :]
    ref_var = jnp.exp(x[:, 1:2, :, :])
    assert mean.shape == (N, 1, H, W) and variance.shape == (N, 1, H, W)
    assert jnp.allclose(mean, ref_mean, atol=1e-6)
    assert jnp.allclose(variance, ref_var, atol=1e-5)

    print("KERNEL_OK")
</pallas_src>

<mosaic_0001>
module attributes {stable_mosaic.version = 11 : i64} {
  func.func @_power_exp_kernel(%arg0: i32, %arg1: i32, %arg2: memref<1x1x2x128xf32, #tpu.memory_space<vmem>>, %arg3: memref<1x1x2x128xf32, #tpu.memory_space<vmem>>, %arg4: memref<1x1x2x128xf32, #tpu.memory_space<vmem>>, %arg5: memref<1x1x2x128xf32, #tpu.memory_space<vmem>>) attributes {dimension_semantics = [#tpu.dimension_semantics<parallel>, #tpu.dimension_semantics<parallel>], iteration_bounds = array<i64: 2, 1>, scalar_prefetch = 0 : i64, scratch_operands = 0 : i64, tpu.core_type = #tpu.core_type<tc>, window_params = [{transform_indices = @transform_0, window_bounds = array<i64: 1, 1, 2, 128>}, {transform_indices = @transform_1, window_bounds = array<i64: 1, 1, 2, 128>}, {transform_indices = @transform_2, window_bounds = array<i64: 1, 1, 2, 128>}, {transform_indices = @transform_3, window_bounds = array<i64: 1, 1, 2, 128>}]} {
    %c0 = arith.constant 0 : index
    %c0_0 = arith.constant 0 : index
    %c0_1 = arith.constant 0 : index
    %c0_2 = arith.constant 0 : index
    %0 = vector.load %arg2[%c0, %c0_0, %c0_1, %c0_2] : memref<1x1x2x128xf32, #tpu.memory_space<vmem>>, vector<1x1x2x128xf32>
    %c0_3 = arith.constant 0 : index
    %c0_4 = arith.constant 0 : index
    %c0_5 = arith.constant 0 : index
    %c0_6 = arith.constant 0 : index
    %1 = vector.load %arg4[%c0_3, %c0_4, %c0_5, %c0_6] : memref<1x1x2x128xf32, #tpu.memory_space<vmem>>, vector<1x1x2x128xf32>
    tpu.vector_store %arg4[%c0_3, %c0_4, %c0_5, %c0_6], %0 {strides = array<i32>} : memref<1x1x2x128xf32, #tpu.memory_space<vmem>>, vector<1x1x2x128xf32>,
    %c0_7 = arith.constant 0 : index
    %c0_8 = arith.constant 0 : index
    %c0_9 = arith.constant 0 : index
    %c0_10 = arith.constant 0 : index
    %2 = vector.load %arg3[%c0_7, %c0_8, %c0_9, %c0_10] : memref<1x1x2x128xf32, #tpu.memory_space<vmem>>, vector<1x1x2x128xf32>
    %3 = math.exp %2 : vector<1x1x2x128xf32>
    %c0_11 = arith.constant 0 : index
    %c0_12 = arith.constant 0 : index
    %c0_13 = arith.constant 0 : index
    %c0_14 = arith.constant 0 : index
    %4 = vector.load %arg5[%c0_11, %c0_12, %c0_13, %c0_14] : memref<1x1x2x128xf32, #tpu.memory_space<vmem>>, vector<1x1x2x128xf32>
    tpu.vector_store %arg5[%c0_11, %c0_12, %c0_13, %c0_14], %3 {strides = array<i32>} : memref<1x1x2x128xf32, #tpu.memory_space<vmem>>, vector<1x1x2x128xf32>,
    return
  }
  func.func @transform_0(%arg0: i32, %arg1: i32) -> (i32, i32, i32, i32) {
    %c0_i32 = arith.constant 0 : i32
    %c0_i32_0 = arith.constant 0 : i32
    %c0_i32_1 = arith.constant 0 : i32
    return %arg0, %c0_i32, %arg1, %c0_i32_0 : i32, i32, i32, i32
  }
  func.func @transform_1(%arg0: i32, %arg1: i32) -> (i32, i32, i32, i32) {
    %c1_i32 = arith.constant 1 : i32
    %c0_i32 = arith.constant 0 : i32
    %c0_i32_0 = arith.constant 0 : i32
    return %arg0, %c1_i32, %arg1, %c0_i32 : i32, i32, i32, i32
  }
  func.func @transform_2(%arg0: i32, %arg1: i32) -> (i32, i32, i32, i32) {
    %c0_i32 = arith.constant 0 : i32
    %c0_i32_0 = arith.constant 0 : i32
    %c0_i32_1 = arith.constant 0 : i32
    return %arg0, %c0_i32, %arg1, %c0_i32_0 : i32, i32, i32, i32
  }
  func.func @transform_3(%arg0: i32, %arg1: i32) -> (i32, i32, i32, i32) {
    %c0_i32 = arith.constant 0 : i32
    %c0_i32_0 = arith.constant 0 : i32
    %c0_i32_1 = arith.constant 0 : i32
    return %arg0, %c0_i32, %arg1, %c0_i32_0 : i32, i32, i32, i32
  }
}

</mosaic_0001>

<bundles_post_ra>
// kernel: tpu_custom_call.1
= control target key start
LH: loop header
LB: loop body
LE: loop exit
PB: predicated region body
PF: predicated region fallthrough
CT: control target
= control target key end

     0   :  { %9 = vsyncpa [#allocation3], 0  ;;  %s938_s0 = inlined_call_operand.hbm [shape: f32[2,2,2,128], index: 0, kind: input, shape index: {}]   ;;  %s939_s1 = inlined_call_operand.hbm [shape: f32[2,2,2,128], index: 1, kind: input, shape index: {}]   ;;  %s940_s2 = inlined_call_operand.hbm [shape: f32[2,1,2,128], index: 2, kind: output, shape index: {0}]   ;;  %s941_s3 = inlined_call_operand.hbm [shape: f32[2,1,2,128], index: 3, kind: output, shape index: {1}]  }
   0x1   :  { %11 = vsyncpa [#allocation3 + $0x1], 0 }
   0x2   :  { %12 = vsyncpa [#allocation6], 0 }
   0x3   :  { %14 = vsyncpa [#allocation6 + $0x1], 0 }
   0x4   :  { %15 = vsyncpa [#allocation4], 0 }
   0x5   :  { %17 = vsyncpa [#allocation4 + $0x1], 0 }
   0x6   :  { %18 = vsyncpa [#allocation9], 0 }
   0x7   :  { %20 = vsyncpa [#allocation9 + $0x1], 0  ;;  %s733_s12 = smov 0   ;;  %s735_s13 = smov 0  }
   0x8   :  { %s737_s14 = smov 0   ;;  %s739_s15 = smov 0  }
   0x9   :  { %s741_s16 = smov 0   ;;  %s743_s17 = smov 0  }
   0xa LB: > { %s439_s18 = sadd.s32 4294967295, %s707_s17   ;;  %s440_s19 = sadd.s32 4294967294, %s707_s17   ;;  %s707_s17 = sphi %s743_s17, %s26_s17   ;;  %s703_s16 = sphi %s741_s16, %s953_s16   ;;  %s699_s15 = sphi %s739_s15, %s952_s15   ;;  %s695_s14 = sphi %s737_s14, %s951_s14   ;;  %s691_s13 = sphi %s735_s13, %s950_s13   ;;  %s687_s12 = sphi %s733_s12, %s949_s12  }
   0xb   : > { %s38_s20 = sadd.s32 1, %s703_s16  ;;  %s47_s21 = sadd.s32 1, %s695_s14 }
   0xc   : > { %p40_p0 = scmp.ge.s32.totalorder %s38_s20, 2  ;;  %p54_p1 = scmp.ne.s32.totalorder %s695_s14, %s691_s13 }
   0xd   : > { %p55_p2 = scmp.eq.s32.totalorder %s707_s17, 0  ;;  %p60_p3 = scmp.ne.s32.totalorder %s691_s13, %s687_s12 }
   0xe   : > { %s955_s20 = smov (%p40_p0, %s38_s20), 0  ;;  %p61_p5 = scmp.eq.s32.totalorder %s439_s18, 0 }
   0xf   : > { %p774_p4 = por %p55_p2, %p54_p1  ;;  %s42_s23 = ssub.s32 %s703_s16, %s955_s20 }
  0x10   : > { %p114_p6 = scmp.eq.s32.totalorder %s439_s18, 1  ;;  %p45_p7 = scmp.eq.s32.totalorder %s42_s23, 0 }
  0x11   : > { %p780_p8 = por %p61_p5, %p60_p3  ;;  %p120_p10 = scmp.eq.s32.totalorder %s440_s19, 1 }
  0x12   : > { %p784_p9 = por %p114_p6, %p54_p1  ;;  %p484_p13 = scmp.lt.s32.totalorder %s707_s17, 2 }
  0x13   : > { %s789_s26 = scalar_select %p45_p7, %s695_s14, %s47_s21  }
  0x14   : > { %p791_p11 = por %p120_p10, %p60_p3  ;;  %s798_s28 = sand.u32 1, %s695_s14  }
  0x15   : > { %s443_s29 = sshll.u32 %s798_s28, 1  ;;  %s460_s30 = sshll.u32 %s703_s16, 6 }
  0x16   : > { %s179_s6 = scalar_lea.hbm %s938_s0, %s460_s30  ;;  %s172_s7 = scalar_lea.vmem [#allocation2], %s443_s29 }
  0x17   : > { %s181_s8 = sshll.u32 %s172_s7, 4  ;;  %p807_p0 = pnand %p484_p13, %p774_p4  ;;  %s182_s8 = int_to_ptr.vmem [resolvable:$true] %s181_s8 }
  0x18   : > { %p449_p1 = scmp.ge.s32.totalorder %s707_s17, 1  ;;  %p207_p2 = scmp.lt.s32.totalorder %s707_s17, 3 }
  0x19   : > { %s169_s10 = scalar_lea.sflag [#allocation3], %s798_s28  ;;  %p538_p3 = pneg %p807_p0 }
  0x1a   : > { %s549_s11 = scalar_lea.vmem %s182_s8, 32  ;;  %s709_s18 = smov [#allocation2]  }
  0x1b   : > { %p550_p5 = scmp.ne.s32.totalorder %s182_s8, %s549_s11  ;;  %s554_s19 = sshll.u32 %s709_s18, 4  ;;  %s555_s19 = int_to_ptr.vmem [resolvable:$false] %s554_s19 }
  0x1c   : > { %s556_s21 = scalar_lea.vmem %s555_s19, 64  ;;  %p557_p4 = scmp.lt.s32.totalorder %s182_s8, %s555_s19 }
  0x1d   : > { %p552_p6 = pnand %p550_p5, %p538_p3  ;;  %p558_p10 = scmp.lt.s32.totalorder %s556_s21, %s549_s11 }
  0x1f   : > { %p553_p7 = pneg %p552_p6  ;;  %p559_p13 = por %p558_p10, %p557_p4 }
  0x21   : > { %p560_p12 = pnand %p559_p13, %p553_p7 }
  0x23   : > { %563 = shalt.err (!%p560_p12)
}
  0x24   : > { %473 = dma.hbm_to_vmem [thread:$0]  (!%p807_p0), %s179_s6, 32, %s182_s8, %s169_s10  }
  0x25   : > { %p825_p5 = pnand %p449_p1, %p207_p2  ;;  %s351_s5 = scalar_lea.hbm %s939_s1, %s460_s30 }
  0x26   : > { %s192_s7 = scalar_lea.vmem [#allocation5], %s443_s29  ;;  %s352_s18 = scalar_lea.hbm %s351_s5, 32 }
  0x27   : > { %s202_s11 = sshll.u32 %s192_s7, 4  ;;  %s189_s19 = scalar_lea.sflag [#allocation6], %s798_s28  ;;  %s203_s11 = int_to_ptr.vmem [resolvable:$true] %s202_s11 }
  0x28   : > { %s577_s21 = scalar_lea.vmem %s203_s11, 32  ;;  %s710_s6 = smov [#allocation5]  }
  0x29   : > { %p578_p12 = scmp.ne.s32.totalorder %s203_s11, %s577_s21  ;;  %s582_s8 = sshll.u32 %s710_s6, 4  ;;  %s583_s8 = int_to_ptr.vmem [resolvable:$false] %s582_s8 }
  0x2a   : > { %s584_s10 = scalar_lea.vmem %s583_s8, 64  ;;  %p585_p1 = scmp.lt.s32.totalorder %s203_s11, %s583_s8 }
  0x2b   : > { %p580_p6 = pnand %p578_p12, %p538_p3  ;;  %p586_p2 = scmp.lt.s32.totalorder %s584_s10, %s577_s21 }
  0x2d   : > { %p581_p7 = pneg %p580_p6  ;;  %p587_p4 = por %p586_p2, %p585_p1 }
  0x2f   : > { %p588_p10 = pnand %p587_p4, %p581_p7 }
  0x31   : > { %591 = shalt.err (!%p588_p10)
}
  0x32   : > { %476 = dma.hbm_to_vmem [thread:$0]  (!%p807_p0), %s352_s18, 32, %s203_s11, %s189_s19  }
  0x33   : > { %211 = sbr.rel (%p825_p5) target bundleno = 109 (0x6d), region = 28  ;;  %s841_s28 = sand.u32 (!%p825_p5), 1, %s691_s13  }
  0x34   : > { %s844_s29 = sshll.u32 (!%p825_p5), %s841_s28, 1  ;;  %s214_s30 = scalar_lea.sflag (!%p825_p5), [#allocation3], %s841_s28 }
  0x35   : > { %s217_s23 = scalar_lea.vmem (!%p825_p5), [#allocation2], %s844_s29 }
  0x38   : > { %670 = dma.done.wait (%p780_p8), %s214_s30, 32  }
  0x39   : > { %672 = vsyncadd (%p780_p8), %s214_s30, 4294967264  ;;  %s223_s9 = scalar_lea.sflag [#allocation6], %s841_s28  ;;  %s226_s22 = scalar_lea.vmem [#allocation5], %s844_s29 }
  0x3a   : > { %674 = dma.done.wait (%p780_p8), %s223_s9, 32  }
  0x3b   : > { %676 = vsyncadd (%p780_p8), %s223_s9, 4294967264  ;;  %s251_s4 = scalar_lea.vmem [#allocation7], %s844_s29  ;;  %s456_s7 = sshll.u32 %s699_s15, 5  ;;  %v259_v0 = vld [vmem:[%s217_s23] sm:$0x3] }
  0x3c   : > { %s285_s5 = sshll.u32 %s251_s4, 4  ;;  %s867_s19 = scalar_lea.hbm %s940_s2, %s456_s7  ;;  %v261_v1 = vld [vmem:[%s226_s22] sm:$0x3]  ;;  %260 = vst [vmem:[%s251_s4] sm:$0x3] %v259_v0  ;;  %s860_s5 = int_to_ptr.vmem [resolvable:$true] %s285_s5 }
  0x3d   : > { %v262_v2 = vmul.f32 1.442695, %v261_v1  ;;  %s266_s24 = scalar_lea.sflag [#allocation4], %s841_s28  ;;  %s593_s21 = scalar_lea.vmem %s860_s5, 32 }
  0x3e   : > { %p594_p8 = scmp.ne.s32.totalorder %s860_s5, %s593_s21  ;;  %s711_s6 = smov [#allocation7]  }
  0x3f   : > { %s597_s8 = sshll.u32 %s711_s6, 4  ;;  %s598_s8 = int_to_ptr.vmem [resolvable:$false] %s597_s8 }
  0x40   : > { %p595_p0 = pnand %p594_p8, %p784_p9  ;;  %s599_s10 = scalar_lea.vmem %s598_s8, 64 }
  0x41   : > { %p600_p13 = scmp.lt.s32.totalorder %s860_s5, %s598_s8  ;;  %p601_p5 = scmp.lt.s32.totalorder %s599_s10, %s593_s21 }
  0x42   : > { %p596_p3 = pneg %p595_p0 }
  0x43   : > { %p602_p12 = por %p601_p5, %p600_p13 }
  0x45   : > { %p603_p6 = pnand %p602_p12, %p596_p3 }
  0x47   : > { %606 = shalt.err (!%p603_p6)
}
  0x48   : > { %s607_s30 = scalar_lea.hbm %s867_s19, 32  ;;  %s611_s22 = scalar_lea.hbm %s940_s2, 64 }
  0x49   : > { %p608_p7 = scmp.ne.s32.totalorder %s867_s19, %s607_s30  ;;  %p612_p4 = scmp.lt.s32.totalorder %s867_s19, %s940_s2 }
  0x4a   : > { %p613_p10 = scmp.lt.s32.totalorder %s611_s22, %s607_s30 }
  0x4b   : > { %p609_p1 = pnand %p608_p7, %p784_p9 }
  0x4c   : > { %p614_p8 = por %p613_p10, %p612_p4 }
  0x4d   : > { %p610_p2 = pneg %p609_p1 }
  0x4f   : > { %p615_p0 = pnand %p614_p8, %p610_p2 }
  0x51   : > { %618 = shalt.err (!%p615_p0)
}
  0x52   : > { %466 = dma.vmem_to_hbm [thread:$0]  (%p784_p9), %s860_s5, 32, %s867_s19, %s266_s24   ;;  %534 = vpow2.f32 %v262_v2 }
  0x53   : > { %s258_s18 = scalar_lea.vmem [#allocation8], %s844_s29  ;;  %s297_s10 = scalar_lea.hbm %s941_s3, %s456_s7 }
  0x54   : > { %s299_s21 = sshll.u32 %s258_s18, 4  ;;  %s271_s30 = scalar_lea.sflag [#allocation9], %s841_s28  ;;  %s891_s21 = int_to_ptr.vmem [resolvable:$true] %s299_s21 }
  0x55   : > { %s619_s23 = scalar_lea.vmem %s891_s21, 32  ;;  %s712_s29 = smov [#allocation8]  }
  0x56   : > { %p620_p3 = scmp.ne.s32.totalorder %s891_s21, %s619_s23  ;;  %s623_s5 = sshll.u32 %s712_s29, 4  ;;  %s624_s5 = int_to_ptr.vmem [resolvable:$false] %s623_s5 }
  0x57   : > { %s625_s19 = scalar_lea.vmem %s624_s5, 64  ;;  %p626_p12 = scmp.lt.s32.totalorder %s891_s21, %s624_s5 }
  0x58   : > { %p621_p13 = pnand %p620_p3, %p784_p9  ;;  %p627_p6 = scmp.lt.s32.totalorder %s625_s19, %s619_s23 }
  0x5a   : > { %p622_p5 = pneg %p621_p13  ;;  %p628_p7 = por %p627_p6, %p626_p12 }
  0x5c   : > { %p629_p1 = pnand %p628_p7, %p622_p5 }
  0x5f   : > { %v535_v3 = vpop.eup %534 }
  0x60   : > { %264 = vst [vmem:[%s258_s18] sm:$0x3] %v535_v3 }
  0x61   : > { %632 = shalt.err (!%p629_p1)
}
  0x62   : > { %s633_s15 = scalar_lea.hbm %s297_s10, 32  ;;  %s637_s24 = scalar_lea.hbm %s941_s3, 64 }
  0x63   : > { %p634_p2 = scmp.ne.s32.totalorder %s297_s10, %s633_s15  ;;  %p638_p8 = scmp.lt.s32.totalorder %s297_s10, %s941_s3 }
  0x64   : > { %p639_p0 = scmp.lt.s32.totalorder %s637_s24, %s633_s15 }
  0x65   : > { %p635_p4 = pnand %p634_p2, %p784_p9 }
  0x66   : > { %p640_p3 = por %p639_p0, %p638_p8 }
  0x67   : > { %p636_p10 = pneg %p635_p4 }
  0x69   : > { %p641_p13 = pnand %p640_p3, %p636_p10 }
  0x6b   : > { %644 = shalt.err (!%p641_p13)
}
  0x6c   : > { %467 = dma.vmem_to_hbm [thread:$0]  (%p784_p9), %s891_s21, 32, %s297_s10, %s271_s30  }
  0x6d PF: > { %s311_s4 = sand.u32 1, %s687_s12   ;;  %p948_p5 = scmp.ge.s32.totalorder %s707_s17, 2 }
  0x6e   : > { %s312_s11 = scalar_lea.sflag [#allocation4], %s311_s4 }
  0x6f   : > { %p478_p12 = pnand %p948_p5, %p791_p11 }
  0x71   : > { %p479_p6 = pneg %p478_p12 }
  0x73   : > { %678 = dma.done.wait (%p479_p6), %s312_s11, 32  }
  0x74   : > { %680 = vsyncadd (%p479_p6), %s312_s11, 4294967264  ;;  %s321_s18 = scalar_lea.sflag [#allocation9], %s311_s4 }
  0x75   : > { %682 = dma.done.wait (%p479_p6), %s321_s18, 32  }
  0x76   : > { %684 = vsyncadd (%p479_p6), %s321_s18, 4294967264  ;;  %s26_s17 = sadd.s32 1, %s707_s17   ;;  %s949_s12 = smov %s691_s13 }
  0x77   : > { %p23_p7 = scmp.ge.s32.totalorder %s26_s17, 4   ;;  %s950_s13 = smov %s695_s14 }
  0x78   : > { %s951_s14 = smov %s789_s26  ;;  %s952_s15 = smov %s703_s16 }
  0x79   : > { %s953_s16 = smov %s955_s20  ;;  %25 = sbr.rel (!%p23_p7) target bundleno = 10 (0xa), region = 103 }
  0x7e   :  { %326 = vsyncpa [#allocation3], 1 }
  0x7f   :  { %328 = vsyncpa [#allocation3 + $0x1], 1 }
  0x80   :  { %329 = vsyncpa [#allocation6], 1 }
  0x81   :  { %331 = vsyncpa [#allocation6 + $0x1], 1 }
  0x82   :  { %332 = vsyncpa [#allocation4], 1 }
  0x83   :  { %334 = vsyncpa [#allocation4 + $0x1], 1 }
  0x84   :  { %335 = vsyncpa [#allocation9], 1 }
  0x85   :  { %337 = vsyncpa [#allocation9 + $0x1], 1 }

</bundles_post_ra>
